<compile_context>
chip_gen: v7x
topology: tpu7x:2x2x1
jax: 0.10.0
libtpu: 0.0.40
codegen_flags: <defaults>
</compile_context>

<pallas_src>
import functools

import jax
import jax.numpy as jnp
from jax import lax
from jax.experimental import pallas as pl
from jax.experimental.pallas import tpu as pltpu


def _round_up(x, m):
    return ((x + m - 1) // m) * m


def _vmem_capacity_bytes():
    try:
        return int(pltpu.get_tpu_info().vmem_capacity_bytes)
    except Exception:
        return 64 * 1024 * 1024  # conservative fallback: v7x per-core VMEM


def _tensorcores_per_chip():
    try:
        kind = jax.devices()[0].device_kind.lower()
    except Exception:
        return 1
    return 2 if ("v7" in kind or "7x" in kind) else 1


def _choose_block_b(B, S_pad, D_pad, H_pad, NH_pad, in_bytes, vmem_cap):
    """Pick how many batch elements to process per grid step (VMEM-aware)."""
    # Resident VMEM per batch element: double-buffered x / mask / output blocks + f32
    # intermediates (x_hidden, sim) produced inside the body.
    per_b = (2 * in_bytes * S_pad * D_pad            # x block (double-buffered)
             + 2 * 4 * 8 * S_pad                     # mask block (f32, sublane-padded)
             + 2 * 4 * NH_pad * (S_pad + D_pad)      # pooled + attention outputs (f32)
             + 4 * S_pad * (H_pad + 128))            # h / sim intermediates (f32)
    fixed = 2 * in_bytes * (D_pad * H_pad + H_pad * 128)   # double-buffered weights
    budget = max(per_b, min(vmem_cap // 2, 48 << 20) - fixed)
    max_bt = max(1, budget // per_b)
    # Enough MXU rows per step to amortize the ~0.35 us step overhead and the per-step
    # stationary-weight load; bigger on 128 MiB-VMEM parts (v5e/v6e).
    target_rows = 2048 if vmem_cap >= (100 << 20) else 1024
    target_bt = max(1, -(-target_rows // S_pad))
    return max(1, int(min(B, max_bt, target_bt)))


def _self_attention_kernel(x_ref, w_ref, wv_ref, mask_ref, out_ref, attn_ref, *, mxu_dtype):
    # x_ref:    (bt, S_pad, D_pad)   in mxu_dtype
    # w_ref:    (D_pad, H_pad)       in mxu_dtype
    # wv_ref:   (H_pad, NH_pad)      in mxu_dtype
    # mask_ref: (bt, 1, S_pad)       f32
    # out_ref:  (bt, NH_pad, D_pad)  f32
    # attn_ref: (bt, NH_pad, S_pad)  f32
    bt, S, D = x_ref.shape
    _, NH = wv_ref.shape

    x = x_ref[...]                                   # read once, reused for both matmuls
    x2d = x.reshape(bt * S, D)                       # tall M dim for the MXU

    # x_hidden = tanh(inputs @ W) -> (bt*S, H); f32 accumulation, tanh on the EUP.
    h = jnp.tanh(jnp.dot(x2d, w_ref[...], preferred_element_type=jnp.float32))

    # similarity = x_hidden @ wv -> (bt*S, NH); only the tiny result is transposed (dense:
    # NH is padded to a sublane multiple).
    sim = jnp.dot(h.astype(mxu_dtype), wv_ref[...], preferred_element_type=jnp.float32)
    sim = jnp.swapaxes(sim.reshape(bt, S, NH), 1, 2)            # (bt, NH, S)

    # Additive mask: user-masked AND padded positions get -10000.
    sim = sim + (1.0 - mask_ref[...]) * -10000.0

    # Numerically stable softmax over the sequence (lane) axis.
    m = jnp.max(sim, axis=-1, keepdims=True)
    e = jnp.exp(sim - m)
    denom = jnp.sum(e, axis=-1, keepdims=True)
    attn = e * pl.reciprocal(denom, approx=True)                # (bt, NH, S) f32

    attn_ref[...] = attn.astype(attn_ref.dtype)

    # pooled = attention @ inputs.  Contract the S axis of x directly so x streams through
    # the MXU against the small stationary attn^T (instead of reloading a (S,D) stationary
    # tile per batch to push NH rows); transpose only the tiny (D, NH) result so the pooled
    # store stays lane-dense on D.
    pooled = lax.dot_general(
        x, attn.astype(mxu_dtype),
        dimension_numbers=(((1,), (2,)), ((0,), (0,))),
        preferred_element_type=jnp.float32)                     # (bt, D, NH)
    out_ref[...] = jnp.swapaxes(pooled, 1, 2).astype(out_ref.dtype)


@functools.partial(jax.jit, static_argnames=("block_b", "mxu_dtype"))
def self_attention(inputs, w_j, wv_j, mask=None, *, block_b=None, mxu_dtype=jnp.float32):
    """Pallas implementation of SelfAttention.forward.

    inputs: (B, S, D), w_j: (D, H) (== W.weight.T), wv_j: (H, n_hops) (== wv.weight.T),
    mask: (B, S) or None.  Returns (pooled (B, n_hops, D), attention (B, n_hops, S)).
    mxu_dtype=jnp.bfloat16 is recommended for throughput on all TPU generations (bf16 HBM
    storage + bf16 MXU operands, f32 accumulation / f32 softmax).
    """
    B, S, D = inputs.shape
    _, H = w_j.shape
    _, n_hops = wv_j.shape
    out_dtype = inputs.dtype

    # Padding: lane-dense output stores and aligned matmul dims; n_hops to a sublane multiple.
    S_pad = _round_up(S, 128)
    D_pad = _round_up(D, 128)
    H_pad = _round_up(H, 128)
    NH_pad = _round_up(n_hops, 8)

    mxu_dtype = jnp.dtype(mxu_dtype)
    in_bytes = mxu_dtype.itemsize
    vmem_cap = _vmem_capacity_bytes()
    n_cores = _tensorcores_per_chip()

    if block_b is None:
        bt = _choose_block_b(B, S_pad, D_pad, H_pad, NH_pad, in_bytes, vmem_cap)
    else:
        bt = int(block_b)
    grid_b = -(-B // bt)
    if n_cores >= 2 and B >= 2:
        # Keep an even number of (parallel) grid steps so both v7x TensorCores get work.
        if grid_b == 1:
            grid_b, bt = 2, -(-B // 2)
        elif grid_b % 2 == 1:
            grid_b += 1  # one extra fully-padded (masked) step; balances the two cores
    B_pad = grid_b * bt

    f32 = jnp.float32
    # Inputs / weights live in HBM already in the MXU dtype: halves the dominant x DMA
    # stream when bf16 and removes all per-step full-block casts inside the kernel.
    x_p = jnp.pad(inputs.astype(mxu_dtype),
                  ((0, B_pad - B), (0, S_pad - S), (0, D_pad - D)))
    w_p = jnp.pad(w_j.astype(mxu_dtype), ((0, D_pad - D), (0, H_pad - H)))
    wv_p = jnp.pad(wv_j.astype(mxu_dtype), ((0, H_pad - H), (0, NH_pad - n_hops)))

    # Effective mask: zeros on padded positions/batches so they are masked out even when the
    # user passes mask=None (the unpadded no-mask path stays identical to PyTorch).
    if mask is None:
        m2 = jnp.ones((B, S), dtype=f32)
    else:
        m2 = mask.astype(f32)
    m_p = jnp.pad(m2, ((0, B_pad - B), (0, S_pad - S)))[:, None, :]   # (B_pad, 1, S_pad)

    out_shapes = (
        jax.ShapeDtypeStruct((B_pad, NH_pad, D_pad), f32),
        jax.ShapeDtypeStruct((B_pad, NH_pad, S_pad), f32),
    )

    grid_spec = pltpu.PrefetchScalarGridSpec(
        num_scalar_prefetch=0,
        grid=(grid_b,),
        in_specs=[
            pl.BlockSpec((bt, S_pad, D_pad), lambda i: (i, 0, 0)),    # inputs
            pl.BlockSpec((D_pad, H_pad), lambda i: (0, 0)),           # W (shared)
            pl.BlockSpec((H_pad, NH_pad), lambda i: (0, 0)),          # wv (shared)
            pl.BlockSpec((bt, 1, S_pad), lambda i: (i, 0, 0)),        # mask
        ],
        out_specs=[
            pl.BlockSpec((bt, NH_pad, D_pad), lambda i: (i, 0, 0)),   # pooled
            pl.BlockSpec((bt, NH_pad, S_pad), lambda i: (i, 0, 0)),   # attention
        ],
    )

    # Explicit VMEM limit sized to the double-buffered blocks + weights + intermediates,
    # clamped inside every generation's physical VMEM (avoids compile-time down-tiling and
    # the 16/32 MiB scoped defaults).
    vmem_need = (2 * in_bytes * bt * S_pad * D_pad
                 + 2 * 4 * bt * 8 * S_pad
                 + 2 * 4 * bt * NH_pad * (S_pad + D_pad)
                 + 2 * in_bytes * (D_pad * H_pad + H_pad * 128)
                 + 4 * bt * S_pad * (H_pad + 128)
                 + (4 << 20))
    vmem_limit = int(min(max(vmem_need, 32 << 20), vmem_cap - (8 << 20)))

    cost = pl.CostEstimate(
        flops=int(2 * B_pad * S_pad * (D_pad * H_pad + H_pad * NH_pad + NH_pad * D_pad)),
        transcendentals=int(B_pad * S_pad * H_pad + B_pad * NH_pad * S_pad),
        bytes_accessed=int(in_bytes * (x_p.size + w_p.size + wv_p.size)
                           + 4 * (m_p.size + B_pad * NH_pad * (D_pad + S_pad))),
    )

    pooled_p, attn_p = pl.pallas_call(
        functools.partial(_self_attention_kernel, mxu_dtype=mxu_dtype),
        out_shape=out_shapes,
        grid_spec=grid_spec,
        compiler_params=pltpu.CompilerParams(
            dimension_semantics=("parallel",),
            vmem_limit_bytes=vmem_limit),
        cost_estimate=cost,
    )(x_p, w_p, wv_p, m_p)

    pooled = pooled_p[:B, :n_hops, :D].astype(out_dtype)
    attn = attn_p[:B, :n_hops, :S].astype(out_dtype)
    return pooled, attn


def _reference(inputs, w_j, wv_j, mask=None):
    """Pure-JAX reference mirroring the PyTorch forward."""
    x = jnp.tanh(inputs @ w_j)                       # (B, S, H)
    sim = jnp.swapaxes(x @ wv_j, 1, 2)               # (B, n_hops, S)
    if mask is not None:
        sim = sim + (1.0 - mask[:, None, :]) * -10000.0
    attn = jax.nn.softmax(sim, axis=-1)              # (B, n_hops, S)
    return attn @ inputs, attn


if __name__ == "__main__":
    # Small shapes consistent with the module's forward pass.
    batch, seq_len = 2, 8
    input_size, hidden_size, n_hops = 32, 16, 2

    key = jax.random.PRNGKey(0)
    k_x, k_w, k_wv, k_m = jax.random.split(key, 4)

    inputs = jax.random.normal(k_x, (batch, seq_len, input_size), dtype=jnp.float32)
    w_j = jax.random.normal(k_w, (input_size, hidden_size), dtype=jnp.float32) * 0.1
    wv_j = jax.random.normal(k_wv, (hidden_size, n_hops), dtype=jnp.float32) * 0.1
    mask = (jax.random.uniform(k_m, (batch, seq_len)) > 0.25).astype(jnp.float32)

    # f32 path (approx reciprocal in the softmax => slightly relaxed tolerance).
    pooled, attn = self_attention(inputs, w_j, wv_j, mask)
    jax.block_until_ready((pooled, attn))
    ref_pooled, ref_attn = _reference(inputs, w_j, wv_j, mask)
    assert pooled.shape == (batch, n_hops, input_size)
    assert attn.shape == (batch, n_hops, seq_len)
    assert jnp.allclose(pooled, ref_pooled, atol=2e-3, rtol=2e-3)
    assert jnp.allclose(attn, ref_attn, atol=2e-3, rtol=2e-3)

    # mask=None path (matches PyTorch's mask=None branch; padding is masked internally).
    pooled2, attn2 = self_attention(inputs, w_j, wv_j, None)
    jax.block_until_ready((pooled2, attn2))
    rp2, ra2 = _reference(inputs, w_j, wv_j, None)
    assert jnp.allclose(pooled2, rp2, atol=2e-3, rtol=2e-3)
    assert jnp.allclose(attn2, ra2, atol=2e-3, rtol=2e-3)

    # bf16 HBM-storage + bf16 MXU-operand fast path; f32 accumulation, looser tolerance.
    pooled3, attn3 = self_attention(inputs, w_j, wv_j, mask, mxu_dtype=jnp.bfloat16)
    jax.block_until_ready((pooled3, attn3))
    assert jnp.allclose(pooled3, ref_pooled, atol=5e-2, rtol=5e-2)
    assert jnp.allclose(attn3, ref_attn, atol=5e-2, rtol=5e-2)

    # Larger, already-aligned shape exercising block_b > 1, NH padding, multi-step grid.
    B2, S2, D2, H2, NH2 = 8, 128, 128, 64, 4
    kk = jax.random.split(jax.random.PRNGKey(1), 4)
    x2 = jax.random.normal(kk[0], (B2, S2, D2), dtype=jnp.float32)
    w2 = jax.random.normal(kk[1], (D2, H2), dtype=jnp.float32) * 0.05
    wv2 = jax.random.normal(kk[2], (H2, NH2), dtype=jnp.float32) * 0.05
    m2 = (jax.random.uniform(kk[3], (B2, S2)) > 0.1).astype(jnp.float32)
    p2, a2 = self_attention(x2, w2, wv2, m2)
    jax.block_until_ready((p2, a2))
    rp, ra = _reference(x2, w2, wv2, m2)
    assert jnp.allclose(p2, rp, atol=2e-3, rtol=2e-3)
    assert jnp.allclose(a2, ra, atol=2e-3, rtol=2e-3)

    # Explicit block_b that forces an uneven batch split (exercises batch padding path).
    p3, a3 = self_attention(x2, w2, wv2, m2, block_b=3)
    jax.block_until_ready((p3, a3))
    assert jnp.allclose(p3, rp, atol=2e-3, rtol=2e-3)
    assert jnp.allclose(a3, ra, atol=2e-3, rtol=2e-3)

    print("KERNEL_OK")
</pallas_src>

<mosaic_0001>
module attributes {stable_mosaic.version = 11 : i64} {
  func.func @_self_attention_kernel(%arg0: i32, %arg1: memref<2x128x128xf32, #tpu.memory_space<vmem>>, %arg2: memref<128x128xf32, #tpu.memory_space<vmem>>, %arg3: memref<128x8xf32, #tpu.memory_space<vmem>>, %arg4: memref<2x1x128xf32, #tpu.memory_space<vmem>>, %arg5: memref<2x8x128xf32, #tpu.memory_space<vmem>>, %arg6: memref<2x8x128xf32, #tpu.memory_space<vmem>>) attributes {dimension_semantics = [#tpu.dimension_semantics<parallel>], iteration_bounds = array<i64: 1>, scalar_prefetch = 0 : i64, scratch_operands = 0 : i64, tpu.core_type = #tpu.core_type<tc>, window_params = [{transform_indices = @transform_0, window_bounds = array<i64: 2, 128, 128>}, {pipeline_mode = #tpu.pipeline_mode<synchronous>, transform_indices = @transform_1, window_bounds = array<i64: 128, 128>}, {pipeline_mode = #tpu.pipeline_mode<synchronous>, transform_indices = @transform_2, window_bounds = array<i64: 128, 8>}, {transform_indices = @transform_3, window_bounds = array<i64: 2, 1, 128>}, {transform_indices = @transform_4, window_bounds = array<i64: 2, 8, 128>}, {transform_indices = @transform_5, window_bounds = array<i64: 2, 8, 128>}]} {
    %c0 = arith.constant 0 : index
    %c0_0 = arith.constant 0 : index
    %c0_1 = arith.constant 0 : index
    %0 = vector.load %arg1[%c0, %c0_0, %c0_1] : memref<2x128x128xf32, #tpu.memory_space<vmem>>, vector<2x128x128xf32>
    %1 = vector.shape_cast %0 : vector<2x128x128xf32> to vector<256x128xf32>
    %c0_2 = arith.constant 0 : index
    %c0_3 = arith.constant 0 : index
    %2 = vector.load %arg2[%c0_2, %c0_3] : memref<128x128xf32, #tpu.memory_space<vmem>>, vector<128x128xf32>
    %cst = arith.constant dense<0.000000e+00> : vector<256x128xf32>
    %3 = tpu.matmul %1, %2, %cst {dimension_numbers = #tpu.dot_dimension_numbers<[1], [0], [0], [1], [0, 0, 1, 1], [], []>} : vector<256x128xf32>, vector<128x128xf32>, vector<256x128xf32> -> vector<256x128xf32>
    %4 = math.tanh %3 : vector<256x128xf32>
    %c0_4 = arith.constant 0 : index
    %c0_5 = arith.constant 0 : index
    %5 = vector.load %arg3[%c0_4, %c0_5] : memref<128x8xf32, #tpu.memory_space<vmem>>, vector<128x8xf32>
    %cst_6 = arith.constant dense<0.000000e+00> : vector<256x8xf32>
    %6 = tpu.matmul %4, %5, %cst_6 {dimension_numbers = #tpu.dot_dimension_numbers<[1], [0], [0], [1], [0, 0, 1, 1], [], []>} : vector<256x128xf32>, vector<128x8xf32>, vector<256x8xf32> -> vector<256x8xf32>
    %7 = vector.shape_cast %6 : vector<256x8xf32> to vector<2x128x8xf32>
    %8 = tpu.transpose %7, [0, 2, 1] : vector<2x128x8xf32> -> vector<2x8x128xf32>
    %c0_7 = arith.constant 0 : index
    %c0_8 = arith.constant 0 : index
    %c0_9 = arith.constant 0 : index
    %9 = vector.load %arg4[%c0_7, %c0_8, %c0_9] : memref<2x1x128xf32, #tpu.memory_space<vmem>>, vector<2x1x128xf32>
    %cst_10 = arith.constant 1.000000e+00 : f32
    %10 = vector.broadcast %cst_10 : f32 to vector<2x1x128xf32>
    %11 = arith.subf %10, %9 : vector<2x1x128xf32>
    %cst_11 = arith.constant -1.000000e+04 : f32
    %12 = vector.broadcast %cst_11 : f32 to vector<2x1x128xf32>
    %13 = arith.mulf %11, %12 : vector<2x1x128xf32>
    %14 = vector.broadcast %13 : vector<2x1x128xf32> to vector<2x8x128xf32>
    %15 = arith.addf %8, %14 : vector<2x8x128xf32>
    %cst_12 = arith.constant dense<0xFF800000> : vector<2x8xf32>
    %16 = vector.multi_reduction <maximumf>, %15, %cst_12 [2] : vector<2x8x128xf32> to vector<2x8xf32>
    %17 = vector.shape_cast %16 : vector<2x8xf32> to vector<2x8x1xf32>
    %18 = vector.broadcast %17 : vector<2x8x1xf32> to vector<2x8x128xf32>
    %19 = arith.subf %15, %18 : vector<2x8x128xf32>
    %20 = math.exp %19 : vector<2x8x128xf32>
    %cst_13 = arith.constant dense<0.000000e+00> : vector<2x8xf32>
    %21 = vector.multi_reduction <add>, %20, %cst_13 [2] : vector<2x8x128xf32> to vector<2x8xf32>
    %22 = vector.shape_cast %21 : vector<2x8xf32> to vector<2x8x1xf32>
    %23 = tpu.reciprocal %22 {approx = true} : vector<2x8x1xf32> -> vector<2x8x1xf32>
    %24 = vector.broadcast %23 : vector<2x8x1xf32> to vector<2x8x128xf32>
    %25 = arith.mulf %20, %24 : vector<2x8x128xf32>
    %c0_14 = arith.constant 0 : index
    %c0_15 = arith.constant 0 : index
    %c0_16 = arith.constant 0 : index
    %26 = vector.load %arg6[%c0_14, %c0_15, %c0_16] : memref<2x8x128xf32, #tpu.memory_space<vmem>>, vector<2x8x128xf32>
    tpu.vector_store %arg6[%c0_14, %c0_15, %c0_16], %25 {strides = array<i32>} : memref<2x8x128xf32, #tpu.memory_space<vmem>>, vector<2x8x128xf32>,
    %cst_17 = arith.constant dense<0.000000e+00> : vector<2x128x8xf32>
    %27 = tpu.matmul %0, %25, %cst_17 {dimension_numbers = #tpu.dot_dimension_numbers<[1], [2], [2], [1], [0, 0, 0, 2, 1, 1], [0], [0]>} : vector<2x128x128xf32>, vector<2x8x128xf32>, vector<2x128x8xf32> -> vector<2x128x8xf32>
    %28 = tpu.transpose %27, [0, 2, 1] : vector<2x128x8xf32> -> vector<2x8x128xf32>
    %c0_18 = arith.constant 0 : index
    %c0_19 = arith.constant 0 : index
    %c0_20 = arith.constant 0 : index
    %29 = vector.load %arg5[%c0_18, %c0_19, %c0_20] : memref<2x8x128xf32, #tpu.memory_space<vmem>>, vector<2x8x128xf32>
    tpu.vector_store %arg5[%c0_18, %c0_19, %c0_20], %28 {strides = array<i32>} : memref<2x8x128xf32, #tpu.memory_space<vmem>>, vector<2x8x128xf32>,
    return
  }
  func.func @transform_0(%arg0: i32) -> (i32, i32, i32) {
    %c0_i32 = arith.constant 0 : i32
    %c0_i32_0 = arith.constant 0 : i32
    %c0_i32_1 = arith.constant 0 : i32
    return %arg0, %c0_i32, %c0_i32_0 : i32, i32, i32
  }
  func.func @transform_1(%arg0: i32) -> (i32, i32) {
    %c0_i32 = arith.constant 0 : i32
    %c0_i32_0 = arith.constant 0 : i32
    %c0_i32_1 = arith.constant 0 : i32
    return %c0_i32, %c0_i32_0 : i32, i32
  }
  func.func @transform_2(%arg0: i32) -> (i32, i32) {
    %c0_i32 = arith.constant 0 : i32
    %c0_i32_0 = arith.constant 0 : i32
    %c0_i32_1 = arith.constant 0 : i32
    return %c0_i32, %c0_i32_0 : i32, i32
  }
  func.func @transform_3(%arg0: i32) -> (i32, i32, i32) {
    %c0_i32 = arith.constant 0 : i32
    %c0_i32_0 = arith.constant 0 : i32
    %c0_i32_1 = arith.constant 0 : i32
    return %arg0, %c0_i32, %c0_i32_0 : i32, i32, i32
  }
  func.func @transform_4(%arg0: i32) -> (i32, i32, i32) {
    %c0_i32 = arith.constant 0 : i32
    %c0_i32_0 = arith.constant 0 : i32
    %c0_i32_1 = arith.constant 0 : i32
    return %arg0, %c0_i32, %c0_i32_0 : i32, i32, i32
  }
  func.func @transform_5(%arg0: i32) -> (i32, i32, i32) {
    %c0_i32 = arith.constant 0 : i32
    %c0_i32_0 = arith.constant 0 : i32
    %c0_i32_1 = arith.constant 0 : i32
    return %arg0, %c0_i32, %c0_i32_0 : i32, i32, i32
  }
}

</mosaic_0001>

<bundles_post_ra>
// kernel: self_attention.1
= control target key start
LH: loop header
LB: loop body
LE: loop exit
PB: predicated region body
PF: predicated region fallthrough
CT: control target
= control target key end

     0   :  { %s2136_s1 = inlined_call_operand.vmem [shape: f32[128,128], index: 1, kind: input, shape index: {}]   ;;  %s2137_s0 = inlined_call_operand.vmem [shape: f32[2,128,128], index: 0, kind: input, shape index: {}]   ;;  %s2138_s2 = inlined_call_operand.vmem [shape: f32[128,8], index: 2, kind: input, shape index: {}]   ;;  %s2139_s3 = inlined_call_operand.vmem [shape: f32[2,1,128], index: 3, kind: input, shape index: {}]   ;;  %s2140_s5 = inlined_call_operand.vmem [shape: f32[2,8,128], index: 5, kind: output, shape index: {1}]   ;;  %s2141_s4 = inlined_call_operand.vmem [shape: f32[2,8,128], index: 4, kind: output, shape index: {0}]  }
   0x1   :  { %v51_v0 = vld [vmem:[%s2136_s1] sm:$0xff]  ;;  %v52_v1 = vld [vmem:[%s2136_s1 + $0x8] sm:$0xff]  ;;  %v53_v2 = vld [vmem:[%s2136_s1 + $0x10] sm:$0xff] }
   0x2   :  { %v1439_v3 = vpack.c.bf16 %v52_v1, %v51_v0  ;;  %v54_v4 = vld [vmem:[%s2136_s1 + $0x18] sm:$0xff]  ;;  %v55_v6 = vld [vmem:[%s2136_s1 + $0x20] sm:$0xff]  ;;  %v56_v7 = vld [vmem:[%s2136_s1 + $0x28] sm:$0xff] }
   0x3   :  { %v1443_v5 = vpack.c.bf16 %v54_v4, %v53_v2  ;;  %v1447_v8 = vpack.c.bf16 %v56_v7, %v55_v6  ;;  %v1738_v9 = vld [vmem:[%s2137_s0] sm:$0xff]  ;;  %v57_v11 = vld [vmem:[%s2136_s1 + $0x30] sm:$0xff]  ;;  %v58_v12 = vld [vmem:[%s2136_s1 + $0x38] sm:$0xff] }
   0x4   :  { %1440 = vmatprep.subr.bf16.mxu0 %v1439_v3  ;;  %v1743_v10 = vld [vmem:[%s2137_s0 + $0x80] sm:$0xff]  ;;  %1259 = vmatprep.mubr.f32.mxu0 %v1738_v9  ;;  %v60_v15 = vld [vmem:[%s2136_s1 + $0x48] sm:$0xff]  ;;  %v1451_v16 = vpack.c.bf16 %v58_v12, %v57_v11  ;;  %v1768_v18 = vld [vmem:[%s2137_s0 + $0x10] sm:$0xff] }
   0x5   :  { %1442 = vmatpush3.bf16.msra.mxu0 %v1439_v3  ;;  %v1503_v13 = vpack.i.bf16 %v1743_v10, %v1738_v9  ;;  %v59_v14 = vld [vmem:[%s2136_s1 + $0x40] sm:$0xff]  ;;  %v1763_v17 = vld [vmem:[%s2137_s0 + $0x8] sm:$0xff]  ;;  %v1773_v19 = vld [vmem:[%s2137_s0 + $0x18] sm:$0xff] }
   0x6   :  { %1444 = vmatprep.subr.bf16.mxu0 %v1443_v5  ;;  %v1778_v20 = vld [vmem:[%s2137_s0 + $0x20] sm:$0xff]  ;;  %v1783_v21 = vld [vmem:[%s2137_s0 + $0x28] sm:$0xff]  ;;  %v1788_v22 = vld [vmem:[%s2137_s0 + $0x30] sm:$0xff]  ;;  %v1455_v32 = vpack.c.bf16 %v60_v15, %v59_v14 }
   0x7   :  { %v1793_v23 = vld [vmem:[%s2137_s0 + $0x88] sm:$0xff]  ;;  %v1798_v24 = vld [vmem:[%s2137_s0 + $0x90] sm:$0xff]  ;;  %v1803_v25 = vld [vmem:[%s2137_s0 + $0x98] sm:$0xff] }
   0x8   :  { %v1505_v26 = vpack.i.bf16 %v1793_v23, %v1763_v17  ;;  %v1507_v27 = vpack.i.bf16 %v1798_v24, %v1768_v18  ;;  %v1509_v28 = vpack.i.bf16 %v1803_v25, %v1773_v19  ;;  %v1814_v29 = vld [vmem:[%s2137_s0 + $0xa0] sm:$0xff]  ;;  %v1819_v30 = vld [vmem:[%s2137_s0 + $0xa8] sm:$0xff]  ;;  %v1824_v31 = vld [vmem:[%s2137_s0 + $0xb0] sm:$0xff] }
   0x9   :  { %1446 = vmatpush3.bf16.msra.mxu0 %v1443_v5  ;;  %v1511_v33 = vpack.i.bf16 %v1814_v29, %v1778_v20  ;;  %v1513_v34 = vpack.i.bf16 %v1819_v30, %v1783_v21  ;;  %v1515_v35 = vpack.i.bf16 %v1824_v31, %v1788_v22  ;;  %v61_v36 = vld [vmem:[%s2136_s1 + $0x50] sm:$0xff]  ;;  %v62_v37 = vld [vmem:[%s2136_s1 + $0x58] sm:$0xff]  ;;  %v324_v38 = vld [vmem:[%s2138_s2] sm:$0xff] }
   0xa   :  { %1448 = vmatprep.subr.bf16.mxu0 %v1447_v8  ;;  %v325_v39 = vld [vmem:[%s2138_s2 + $0x8] sm:$0xff]  ;;  %v326_v40 = vld [vmem:[%s2138_s2 + $0x10] sm:$0xff]  ;;  %v1459_v41 = vpack.c.bf16 %v62_v37, %v61_v36  ;;  %v63_v42 = vld [vmem:[%s2136_s1 + $0x60] sm:$0xff] }
   0xb   :  { %v1471_v43 = vpack.c.bf16 %v325_v39, %v324_v38  ;;  %v327_v44 = vld [vmem:[%s2138_s2 + $0x18] sm:$0xff]  ;;  %v64_v45 = vld [vmem:[%s2136_s1 + $0x68] sm:$0xff]  ;;  %v328_v47 = vld [vmem:[%s2138_s2 + $0x20] sm:$0xff] }
   0xc   :  { %v1475_v46 = vpack.c.bf16 %v327_v44, %v326_v40  ;;  %v329_v48 = vld [vmem:[%s2138_s2 + $0x28] sm:$0xff]  ;;  %v1463_v49 = vpack.c.bf16 %v64_v45, %v63_v42  ;;  %v65_v50 = vld [vmem:[%s2136_s1 + $0x70] sm:$0xff]  ;;  %v66_v52 = vld [vmem:[%s2136_s1 + $0x78] sm:$0xff] }
   0xd   :  { %1450 = vmatpush3.bf16.msra.mxu0 %v1447_v8  ;;  %1472 = vmatprep.subr.bf16.mxu1 %v1471_v43  ;;  %v1479_v51 = vpack.c.bf16 %v329_v48, %v328_v47  ;;  %v330_v53 = vld [vmem:[%s2138_s2 + $0x30] sm:$0xff]  ;;  %v331_v54 = vld [vmem:[%s2138_s2 + $0x38] sm:$0xff]  ;;  %v1467_v55 = vpack.c.bf16 %v66_v52, %v65_v50  ;;  %v332_v57 = vld [vmem:[%s2138_s2 + $0x40] sm:$0xff] }
   0xe   :  { %1452 = vmatprep.subr.bf16.mxu0 %v1451_v16  ;;  %1474 = vmatpush3.bf16.msra.mxu1 %v1471_v43  ;;  %v1483_v56 = vpack.c.bf16 %v331_v54, %v330_v53  ;;  %v333_v58 = vld [vmem:[%s2138_s2 + $0x48] sm:$0xff]  ;;  %v1889_v60 = vld [vmem:[%s2137_s0 + $0x38] sm:$0xff]  ;;  %v1894_v61 = vld [vmem:[%s2137_s0 + $0x40] sm:$0xff] }
   0xf   :  { %1476 = vmatprep.subr.bf16.mxu1 %v1475_v46  ;;  %v1487_v59 = vpack.c.bf16 %v333_v58, %v332_v57  ;;  %v1901_v62 = vld [vmem:[%s2137_s0 + $0x48] sm:$0xff]  ;;  %v1906_v63 = vld [vmem:[%s2137_s0 + $0x50] sm:$0xff]  ;;  %v1913_v0 = vld [vmem:[%s2137_s0 + $0x58] sm:$0xff] }
  0x10   :  { %v1918_v1 = vld [vmem:[%s2137_s0 + $0x60] sm:$0xff]  ;;  %v1925_v2 = vld [vmem:[%s2137_s0 + $0x68] sm:$0xff]  ;;  %v1930_v3 = vld [vmem:[%s2137_s0 + $0x70] sm:$0xff] }
  0x11   :  { %1454 = vmatpush3.bf16.msra.mxu0 %v1451_v16  ;;  %v1937_v4 = vld [vmem:[%s2137_s0 + $0x78] sm:$0xff]  ;;  %v1955_v6 = vld [vmem:[%s2137_s0 + $0xc0] sm:$0xff]  ;;  %v1962_v7 = vld [vmem:[%s2137_s0 + $0xc8] sm:$0xff] }
  0x12   :  { %1456 = vmatprep.subr.bf16.mxu0 %v1455_v32  ;;  %1478 = vmatpush3.bf16.msra.mxu1 %v1475_v46  ;;  %v1950_v5 = vld [vmem:[%s2137_s0 + $0xb8] sm:$0xff]  ;;  %v1967_v8 = vld [vmem:[%s2137_s0 + $0xd0] sm:$0xff]  ;;  %v1979_v12 = vld [vmem:[%s2137_s0 + $0xe0] sm:$0xff] }
  0x13   :  { %1480 = vmatprep.subr.bf16.mxu1 %v1479_v51  ;;  %v1974_v11 = vld [vmem:[%s2137_s0 + $0xd8] sm:$0xff]  ;;  %v1986_v14 = vld [vmem:[%s2137_s0 + $0xe8] sm:$0xff]  ;;  %v1991_v15 = vld [vmem:[%s2137_s0 + $0xf0] sm:$0xff]  ;;  %v1517_v9 = vpack.i.bf16 %v1950_v5, %v1889_v60 }
  0x14   :  { %v1998_v16 = vld [vmem:[%s2137_s0 + $0xf8] sm:$0xff]  ;;  %v336_v38 = vld [vmem:[%s2138_s2 + $0x60] sm:$0xff]  ;;  %v337_v39 = vld [vmem:[%s2138_s2 + $0x68] sm:$0xff] }
  0x15   :  { %1458 = vmatpush3.bf16.msra.mxu0 %v1455_v32  ;;  %v334_v32 = vld [vmem:[%s2138_s2 + $0x50] sm:$0xff]  ;;  %v335_v36 = vld [vmem:[%s2138_s2 + $0x58] sm:$0xff]  ;;  %v1495_v40 = vpack.c.bf16 %v337_v39, %v336_v38 }
  0x16   :  { %1460 = vmatprep.subr.bf16.mxu0 %v1459_v41  ;;  %1482 = vmatpush3.bf16.msra.mxu1 %v1479_v51  ;;  %v1491_v37 = vpack.c.bf16 %v335_v36, %v334_v32  ;;  %v339_v42 = vld [vmem:[%s2138_s2 + $0x78] sm:$0xff] }
  0x17   :  { %1484 = vmatprep.subr.bf16.mxu1 %v1483_v56 }
  0x19   :  { %1462 = vmatpush3.bf16.msra.mxu0 %v1459_v41  ;;  %v338_v41 = vld [vmem:[%s2138_s2 + $0x70] sm:$0xff] }
  0x1a   :  { %1464 = vmatprep.subr.bf16.mxu0 %v1463_v49  ;;  %1486 = vmatpush3.bf16.msra.mxu1 %v1483_v56  ;;  %v1499_v43 = vpack.c.bf16 %v339_v42, %v338_v41 }
  0x1b   :  { %1488 = vmatprep.subr.bf16.mxu1 %v1487_v59 }
  0x1d   :  { %1466 = vmatpush3.bf16.msra.mxu0 %v1463_v49 }
  0x1e   :  { %1468 = vmatprep.subr.bf16.mxu0 %v1467_v55  ;;  %1490 = vmatpush3.bf16.msra.mxu1 %v1487_v59 }
  0x1f   :  { %1492 = vmatprep.subr.bf16.mxu1 %v1491_v37 }
  0x21   :  { %1470 = vmatpush3.bf16.msra.mxu0 %v1467_v55 }
  0x22   :  { %1494 = vmatpush3.bf16.msra.mxu1 %v1491_v37 }
  0x23   :  { %1496 = vmatprep.subr.bf16.mxu1 %v1495_v40 }
  0x24   :  { %1260 = vmatmul.mubr.f32.vlgmr.msra.gmra.mrb[0].mxu0 %v1763_v17  ;;  %v1523_v17 = vpack.i.bf16 %v1967_v8, %v1906_v63 }
  0x25   :  { %1262 = vmatprep.mubr.f32.mxu0 %v1768_v18  ;;  %v1525_v18 = vpack.i.bf16 %v1974_v11, %v1913_v0 }
  0x26   :  { %1498 = vmatpush3.bf16.msra.mxu1 %v1495_v40 }
  0x27   :  { %1500 = vmatprep.subr.bf16.mxu1 %v1499_v43 }
  0x28   :  { %1263 = vmatmul.mubr.f32.gmra.mrb[2].mxu0 %v1773_v19  ;;  %v1527_v19 = vpack.i.bf16 %v1979_v12, %v1918_v1 }
  0x29   :  { %1265 = vmatprep.mubr.f32.mxu0 %v1778_v20  ;;  %v1529_v20 = vpack.i.bf16 %v1986_v14, %v1925_v2 }
  0x2a   :  { %1502 = vmatpush3.bf16.msra.mxu1 %v1499_v43 }
  0x2c   :  { %1266 = vmatmul.mubr.f32.gmra.mrb[4].mxu0 %v1783_v21  ;;  %v1531_v21 = vpack.i.bf16 %v1991_v15, %v1930_v3 }
  0x2d   :  { %1268 = vmatprep.mubr.f32.mxu0 %v1788_v22  ;;  %v1533_v22 = vpack.i.bf16 %v1998_v16, %v1937_v4 }
  0x30   :  { %1269 = vmatmul.mubr.f32.gmra.mrb[6].mxu0 %v1889_v60 }
  0x31   :  { %1271 = vmatprep.mubr.f32.mxu0 %v1894_v61 }
  0x34   :  { %1272 = vmatmul.mubr.f32.gmra.mrb[8].mxu0 %v1901_v62 }
  0x35   :  { %1274 = vmatprep.mubr.f32.mxu0 %v1906_v63 }
  0x38   :  { %1275 = vmatmul.mubr.f32.gmra.mrb[10].mxu0 %v1913_v0 }
  0x39   :  { %1277 = vmatprep.mubr.f32.mxu0 %v1918_v1 }
  0x3c   :  { %1278 = vmatmul.mubr.f32.gmra.mrb[12].mxu0 %v1925_v2 }
  0x3d   :  { %1280 = vmatprep.mubr.f32.mxu0 %v1930_v3 }
  0x40   :  { %1281 = vmatmul.mubr.f32.gmra.mrb[14].mxu0 %v1937_v4 }
  0x41   :  { %1283 = vmatprep.mubr.f32.mxu0 %v1743_v10  ;;  %v1519_v10 = vpack.i.bf16 %v1955_v6, %v1894_v61 }
  0x44   :  { %1284 = vmatmul.mubr.f32.gmra.mrb[16].mxu0 %v1793_v23 }
  0x45   :  { %1286 = vmatprep.mubr.f32.mxu0 %v1798_v24 }
  0x48   :  { %1287 = vmatmul.mubr.f32.gmra.mrb[18].mxu0 %v1803_v25 }
  0x49   :  { %1289 = vmatprep.mubr.f32.mxu0 %v1814_v29 }
  0x4c   :  { %1290 = vmatmul.mubr.f32.gmra.mrb[20].mxu0 %v1819_v30 }
  0x4d   :  { %1292 = vmatprep.mubr.f32.mxu0 %v1824_v31 }
  0x50   :  { %1293 = vmatmul.mubr.f32.gmra.mrb[22].mxu0 %v1950_v5 }
  0x51   :  { %1295 = vmatprep.mubr.f32.mxu0 %v1955_v6 }
  0x54   :  { %1296 = vmatmul.mubr.f32.gmra.mrb[24].mxu0 %v1962_v7 }
  0x55   :  { %1298 = vmatprep.mubr.f32.mxu0 %v1967_v8 }
  0x58   :  { %1299 = vmatmul.mubr.f32.gmra.mrb[26].mxu0 %v1974_v11 }
  0x59   :  { %1301 = vmatprep.mubr.f32.mxu0 %v1979_v12 }
  0x5c   :  { %1302 = vmatmul.mubr.f32.gmra.mrb[28].mxu0 %v1986_v14 }
  0x5d   :  { %1304 = vmatprep.mubr.f32.mxu0 %v1991_v15 }
  0x60   :  { %1305 = vmatmul.mubr.f32.gmra.mrb[30].mxu0 %v1998_v16 }
  0xf7   :  { %v1261_v44 = vpop.f32.mrb[0].mxu0 }
  0xf8   :  { %v133_v45 = vpop.f32.mrb[1].mxu0 }
  0xf9   :  { %1615 = vtanh.f32 %v133_v45 }
  0xfa   :  { %1617 = vtanh.f32 %v1261_v44 }
  0xfb   :  { %v1264_v46 = vpop.f32.mrb[2].mxu0 }
  0xfc   :  { %v143_v47 = vpop.f32.mrb[3].mxu0 }
  0xfd   :  { %1619 = vtanh.f32 %v143_v47 }
  0xfe   :  { %1621 = vtanh.f32 %v1264_v46 }
  0xff   :  { %v1267_v48 = vpop.f32.mrb[4].mxu0 }
 0x100   :  { %v153_v49 = vpop.f32.mrb[5].mxu0 }
 0x101   :  { %1623 = vtanh.f32 %v153_v49 }
 0x102   :  { %1625 = vtanh.f32 %v1267_v48 }
 0x103   :  { %v1616_v50 = vpop.eup %1615  ;;  %v1270_v51 = vpop.f32.mrb[6].mxu0 }
 0x104   :  { %v1618_v52 = vpop.eup %1617  ;;  %v163_v53 = vpop.f32.mrb[7].mxu0  ;;  %1339 = vmatprep.mubr.f32.mxu1 %v1616_v50 }
 0x105   :  { %1627 = vtanh.f32 %v163_v53  ;;  %1340 = vmatmul.mubr.f32.vlgmr.msra.gmra.mrb[0].mxu1 %v1618_v52 }
 0x106   :  { %1629 = vtanh.f32 %v1270_v51 }
 0x107   :  { %v1620_v54 = vpop.eup %1619  ;;  %v1273_v55 = vpop.f32.mrb[8].mxu0 }
 0x108   :  { %v1622_v56 = vpop.eup %1621  ;;  %v173_v57 = vpop.f32.mrb[9].mxu0  ;;  %1342 = vmatprep.mubr.f32.mxu1 %v1620_v54 }
 0x109   :  { %1631 = vtanh.f32 %v173_v57  ;;  %1343 = vmatmul.mubr.f32.gmra.mrb[2].mxu1 %v1622_v56 }
 0x10a   :  { %1633 = vtanh.f32 %v1273_v55 }
 0x10b   :  { %v1624_v58 = vpop.eup %1623  ;;  %v1276_v59 = vpop.f32.mrb[10].mxu0 }
 0x10c   :  { %v1626_v32 = vpop.eup %1625  ;;  %v183_v36 = vpop.f32.mrb[11].mxu0  ;;  %1345 = vmatprep.mubr.f32.mxu1 %v1624_v58 }
 0x10d   :  { %1635 = vtanh.f32 %v183_v36  ;;  %1346 = vmatmul.mubr.f32.gmra.mrb[4].mxu1 %v1626_v32 }
 0x10e   :  { %1637 = vtanh.f32 %v1276_v59 }
 0x10f   :  { %v1628_v37 = vpop.eup %1627  ;;  %v1279_v38 = vpop.f32.mrb[12].mxu0 }
 0x110   :  { %v1630_v39 = vpop.eup %1629  ;;  %v193_v40 = vpop.f32.mrb[13].mxu0  ;;  %1348 = vmatprep.mubr.f32.mxu1 %v1628_v37 }
 0x111   :  { %1639 = vtanh.f32 %v193_v40  ;;  %1349 = vmatmul.mubr.f32.gmra.mrb[6].mxu1 %v1630_v39 }
 0x112   :  { %1641 = vtanh.f32 %v1279_v38 }
 0x113   :  { %v1632_v41 = vpop.eup %1631  ;;  %v1282_v42 = vpop.f32.mrb[14].mxu0 }
 0x114   :  { %v1634_v43 = vpop.eup %1633  ;;  %v203_v44 = vpop.f32.mrb[15].mxu0  ;;  %1351 = vmatprep.mubr.f32.mxu1 %v1632_v41 }
 0x115   :  { %1643 = vtanh.f32 %v203_v44  ;;  %1352 = vmatmul.mubr.f32.gmra.mrb[8].mxu1 %v1634_v43 }
 0x116   :  { %1645 = vtanh.f32 %v1282_v42 }
 0x117   :  { %v1636_v45 = vpop.eup %1635  ;;  %v1285_v46 = vpop.f32.mrb[16].mxu0 }
 0x118   :  { %v1638_v47 = vpop.eup %1637  ;;  %v213_v48 = vpop.f32.mrb[17].mxu0  ;;  %1354 = vmatprep.mubr.f32.mxu1 %v1636_v45 }
 0x119   :  { %1647 = vtanh.f32 %v213_v48  ;;  %1355 = vmatmul.mubr.f32.gmra.mrb[10].mxu1 %v1638_v47 }
 0x11a   :  { %1649 = vtanh.f32 %v1285_v46 }
 0x11b   :  { %v1640_v49 = vpop.eup %1639  ;;  %v1288_v50 = vpop.f32.mrb[18].mxu0 }
 0x11c   :  { %v1642_v51 = vpop.eup %1641  ;;  %1651 = vtanh.f32 %v1288_v50  ;;  %1357 = vmatprep.mubr.f32.mxu1 %v1640_v49  ;;  %v223_v52 = vpop.f32.mrb[19].mxu0 }
 0x11d   :  { %1653 = vtanh.f32 %v223_v52  ;;  %1358 = vmatmul.mubr.f32.gmra.mrb[12].mxu1 %v1642_v51 }
 0x11f   :  { %v1644_v53 = vpop.eup %1643  ;;  %v1291_v54 = vpop.f32.mrb[20].mxu0 }
 0x120   :  { %v1646_v55 = vpop.eup %1645  ;;  %1360 = vmatprep.mubr.f32.mxu1 %v1644_v53  ;;  %1655 = vtanh.f32 %v1291_v54  ;;  %v233_v56 = vpop.f32.mrb[21].mxu0 }
 0x121   :  { %1361 = vmatmul.mubr.f32.gmra.mrb[14].mxu1 %v1646_v55  ;;  %1657 = vtanh.f32 %v233_v56 }
 0x123   :  { %v1648_v57 = vpop.eup %1647  ;;  %v1294_v58 = vpop.f32.mrb[22].mxu0 }
 0x124   :  { %v1650_v59 = vpop.eup %1649  ;;  %1363 = vmatprep.mubr.f32.mxu1 %v1648_v57  ;;  %1659 = vtanh.f32 %v1294_v58  ;;  %v243_v32 = vpop.f32.mrb[23].mxu0 }
 0x125   :  { %1364 = vmatmul.mubr.f32.gmra.mrb[16].mxu1 %v1650_v59  ;;  %1661 = vtanh.f32 %v243_v32 }
 0x126   :  { %v1652_v36 = vpop.eup %1651 }
 0x127   :  { %v1654_v37 = vpop.eup %1653  ;;  %v1297_v38 = vpop.f32.mrb[24].mxu0 }
 0x128   :  { %1366 = vmatprep.mubr.f32.mxu1 %v1654_v37  ;;  %1663 = vtanh.f32 %v1297_v38  ;;  %v253_v39 = vpop.f32.mrb[25].mxu0 }
 0x129   :  { %1367 = vmatmul.mubr.f32.gmra.mrb[18].mxu1 %v1652_v36  ;;  %1665 = vtanh.f32 %v253_v39 }
 0x12a   :  { %v1656_v40 = vpop.eup %1655 }
 0x12b   :  { %v1658_v41 = vpop.eup %1657  ;;  %v1300_v42 = vpop.f32.mrb[26].mxu0 }
 0x12c   :  { %1369 = vmatprep.mubr.f32.mxu1 %v1658_v41  ;;  %1667 = vtanh.f32 %v1300_v42  ;;  %v263_v43 = vpop.f32.mrb[27].mxu0 }
 0x12d   :  { %1370 = vmatmul.mubr.f32.gmra.mrb[20].mxu1 %v1656_v40  ;;  %1669 = vtanh.f32 %v263_v43 }
 0x12e   :  { %v1660_v44 = vpop.eup %1659 }
 0x12f   :  { %v1662_v45 = vpop.eup %1661  ;;  %v1303_v46 = vpop.f32.mrb[28].mxu0 }
 0x130   :  { %1372 = vmatprep.mubr.f32.mxu1 %v1662_v45  ;;  %1671 = vtanh.f32 %v1303_v46  ;;  %v273_v47 = vpop.f32.mrb[29].mxu0 }
 0x131   :  { %1373 = vmatmul.mubr.f32.gmra.mrb[22].mxu1 %v1660_v44  ;;  %1673 = vtanh.f32 %v273_v47 }
 0x132   :  { %v1664_v48 = vpop.eup %1663 }
 0x133   :  { %v1666_v49 = vpop.eup %1665  ;;  %v1306_v50 = vpop.f32.mrb[30].mxu0 }
 0x134   :  { %1375 = vmatprep.mubr.f32.mxu1 %v1666_v49  ;;  %1675 = vtanh.f32 %v1306_v50  ;;  %v283_v51 = vpop.f32.mrb[31].mxu0 }
 0x135   :  { %1376 = vmatmul.mubr.f32.gmra.mrb[24].mxu1 %v1664_v48  ;;  %1677 = vtanh.f32 %v283_v51 }
 0x136   :  { %v1668_v52 = vpop.eup %1667 }
 0x137   :  { %v1670_v53 = vpop.eup %1669 }
 0x138   :  { %1378 = vmatprep.mubr.f32.mxu1 %v1670_v53 }
 0x139   :  { %1379 = vmatmul.mubr.f32.gmra.mrb[26].mxu1 %v1668_v52 }
 0x13a   :  { %v1672_v54 = vpop.eup %1671 }
 0x13b   :  { %v1674_v55 = vpop.eup %1673 }
 0x13c   :  { %1381 = vmatprep.mubr.f32.mxu1 %v1674_v55 }
 0x13d   :  { %1382 = vmatmul.mubr.f32.gmra.mrb[28].mxu1 %v1672_v54 }
 0x13e   :  { %v1676_v56 = vpop.eup %1675 }
 0x13f   :  { %v1678_v57 = vpop.eup %1677 }
 0x140   :  { %1384 = vmatprep.mubr.f32.mxu1 %v1678_v57 }
 0x141   :  { %1385 = vmatmul.mubr.f32.gmra.mrb[30].mxu1 %v1676_v56 }
 0x1d8   :  { %v1341_v58 = vpop.f32.mrb[0].mxu1 }
 0x1d9   :  { %v406_v59 = vpop.f32.mrb[1].mxu1 }
 0x1da   :  { %565 = vxpose.xlu0.b32.start [1/16] (narrow) %v406_v59, 8 }
 0x1dc   :  { %v1344_v32 = vpop.f32.mrb[2].mxu1 }
 0x1dd   :  { %v416_v36 = vpop.f32.mrb[3].mxu1 }
 0x1de   :  { %566 = vxpose.xlu0.b32.cont [2/16] (narrow) %v1341_v58, 8 }
 0x1e0   :  { %v1347_v37 = vpop.f32.mrb[4].mxu1 }
 0x1e1   :  { %v426_v38 = vpop.f32.mrb[5].mxu1 }
 0x1e2   :  { %567 = vxpose.xlu0.b32.cont [3/16] (narrow) %v416_v36, 8 }
 0x1e4   :  { %v1350_v39 = vpop.f32.mrb[6].mxu1 }
 0x1e5   :  { %v436_v40 = vpop.f32.mrb[7].mxu1 }
 0x1e6   :  { %568 = vxpose.xlu0.b32.cont [4/16] (narrow) %v1344_v32, 8 }
 0x1e8   :  { %v1353_v41 = vpop.f32.mrb[8].mxu1 }
 0x1e9   :  { %v446_v42 = vpop.f32.mrb[9].mxu1 }
 0x1ea   :  { %569 = vxpose.xlu0.b32.cont [5/16] (narrow) %v426_v38, 8 }
 0x1ec   :  { %v1356_v43 = vpop.f32.mrb[10].mxu1 }
 0x1ed   :  { %v456_v44 = vpop.f32.mrb[11].mxu1 }
 0x1ee   :  { %570 = vxpose.xlu0.b32.cont [6/16] (narrow) %v1347_v37, 8 }
 0x1f0   :  { %v1359_v45 = vpop.f32.mrb[12].mxu1 }
 0x1f1   :  { %v466_v46 = vpop.f32.mrb[13].mxu1 }
 0x1f2   :  { %571 = vxpose.xlu0.b32.cont [7/16] (narrow) %v436_v40, 8  ;;  %v637_v40 = vlaneseq }
 0x1f4   :  { %v1362_v47 = vpop.f32.mrb[14].mxu1 }
 0x1f5   :  { %v476_v48 = vpop.f32.mrb[15].mxu1 }
 0x1f6   :  { %572 = vxpose.xlu0.b32.cont [8/16] (narrow) %v1350_v39, 8 }
 0x1f8   :  { %v1365_v49 = vpop.f32.mrb[16].mxu1 }
 0x1f9   :  { %v486_v50 = vpop.f32.mrb[17].mxu1 }
 0x1fa   :  { %573 = vxpose.xlu0.b32.cont [9/16] (narrow) %v446_v42, 8  ;;  %597 = vxpose.xlu1.b32.start [1/16] (narrow) %v486_v50, 8 }
 0x1fc   :  { %v1368_v51 = vpop.f32.mrb[18].mxu1 }
 0x1fd   :  { %v496_v52 = vpop.f32.mrb[19].mxu1 }
 0x1fe   :  { %574 = vxpose.xlu0.b32.cont [10/16] (narrow) %v1353_v41, 8  ;;  %598 = vxpose.xlu1.b32.cont [2/16] (narrow) %v1365_v49, 8  ;;  %v629_v41 = vld [vmem:[%s2139_s3] sm:$0x1]  ;;  %v630_v49 = vld [vmem:[%s2139_s3 + $0x1] sm:$0x1] }
 0x1ff   :  { %v631_v42 = vsub.f32 1.0, %v629_v41  ;;  %v632_v50 = vsub.f32 1.0, %v630_v49 }
 0x200   :  { %v1371_v53 = vpop.f32.mrb[20].mxu1 }
 0x201   :  { %v506_v54 = vpop.f32.mrb[21].mxu1 }
 0x202   :  { %575 = vxpose.xlu0.b32.cont [11/16] (narrow) %v456_v44, 8  ;;  %599 = vxpose.xlu1.b32.cont [3/16] (narrow) %v496_v52, 8  ;;  %v633_v44 = vmul.f32 -10000.0, %v631_v42 }
 0x204   :  { %v1374_v55 = vpop.f32.mrb[22].mxu1 }
 0x205   :  { %v516_v56 = vpop.f32.mrb[23].mxu1 }
 0x206   :  { %576 = vxpose.xlu0.b32.cont [12/16] (narrow) %v1356_v43, 8  ;;  %600 = vxpose.xlu1.b32.cont [4/16] (narrow) %v1368_v51, 8  ;;  %v638_v43 = vshrl.u32 %v637_v40, 7  ;;  %v634_v51 = vmul.f32 -10000.0, %v632_v50 }
 0x208   :  { %v1377_v57 = vpop.f32.mrb[24].mxu1 }
 0x209   :  { %v526_v58 = vpop.f32.mrb[25].mxu1 }
 0x20a   :  { %577 = vxpose.xlu0.b32.cont [13/16] (narrow) %v466_v46, 8  ;;  %601 = vxpose.xlu1.b32.cont [5/16] (narrow) %v506_v54, 8 }
 0x20c   :  { %v1380_v59 = vpop.f32.mrb[26].mxu1 }
 0x20d   :  { %v536_v32 = vpop.f32.mrb[27].mxu1 }
 0x20e   :  { %578 = vxpose.xlu0.b32.cont [14/16] (narrow) %v1359_v45, 8  ;;  %602 = vxpose.xlu1.b32.cont [6/16] (narrow) %v1371_v53, 8  ;;  %v639_v45 = vsub.s32 0, %v638_v43 }
 0x210   :  { %v1383_v36 = vpop.f32.mrb[28].mxu1  ;;  %v640_v46 = vrot.slane %v633_v44, %v639_v45  ;;  %v644_v52 = vrot.slane %v634_v51, %v639_v45 }
 0x211   :  { %v546_v37 = vpop.f32.mrb[29].mxu1 }
 0x212   :  { %579 = vxpose.xlu0.b32.cont [15/16] (narrow) %v476_v48, 8  ;;  %603 = vxpose.xlu1.b32.cont [7/16] (narrow) %v516_v56, 8 }
 0x214   :  { %v1386_v38 = vpop.f32.mrb[30].mxu1 }
 0x215   :  { %v556_v39 = vpop.f32.mrb[31].mxu1 }
 0x216   :  { %580 = vxpose.xlu0.b32.end [16/16] (narrow) %v1362_v47, 8  ;;  %604 = vxpose.xlu1.b32.cont [8/16] (narrow) %v1374_v55, 8 }
 0x21a   :  { %605 = vxpose.xlu1.b32.cont [9/16] (narrow) %v526_v58, 8 }
 0x21e   :  { %606 = vxpose.xlu1.b32.cont [10/16] (narrow) %v1377_v57, 8 }
 0x222   :  { %607 = vxpose.xlu1.b32.cont [11/16] (narrow) %v536_v32, 8 }
 0x226   :  { %608 = vxpose.xlu1.b32.cont [12/16] (narrow) %v1380_v59, 8 }
 0x22a   :  { %609 = vxpose.xlu1.b32.cont [13/16] (narrow) %v546_v37, 8 }
 0x22e   :  { %610 = vxpose.xlu1.b32.cont [14/16] (narrow) %v1383_v36, 8 }
 0x232   :  { %611 = vxpose.xlu1.b32.cont [15/16] (narrow) %v556_v39, 8 }
 0x236   :  { %612 = vxpose.xlu1.b32.end [16/16] (narrow) %v1386_v38, 8 }
 0x25a   :  { %v581_v47 = vpop.trf.xlu0 }
 0x25b   :  { %v647_v48 = vadd.f32 %v640_v46, %v581_v47 }
 0x25d   :  { %649 = vmax.xlane.f32.xlu0 %v647_v48 }
 0x27a   :  { %v613_v53 = vpop.trf.xlu1 }
 0x27b   :  { %v648_v54 = vadd.f32 %v644_v52, %v613_v53 }
 0x27d   :  { %651 = vmax.xlane.f32.xlu1 %v648_v54 }
 0x28a   :  { %1504 = vxpose.xlu0.b32.start [1/16] %v1503_v13, 128  ;;  %v1521_v13 = vpack.i.bf16 %v1962_v7, %v1901_v62 }
 0x28e   :  { %1506 = vxpose.xlu0.b32.cont [2/16] %v1505_v26, 128 }
 0x292   :  { %1508 = vxpose.xlu0.b32.cont [3/16] %v1507_v27, 128 }
 0x296   :  { %1510 = vxpose.xlu0.b32.cont [4/16] %v1509_v28, 128 }
 0x29a   :  { %1512 = vxpose.xlu0.b32.cont [5/16] %v1511_v33, 128 }
 0x29e   :  { %1514 = vxpose.xlu0.b32.cont [6/16] %v1513_v34, 128 }
 0x2a2   :  { %1516 = vxpose.xlu0.b32.cont [7/16] %v1515_v35, 128 }
 0x2a6   :  { %1518 = vxpose.xlu0.b32.cont [8/16] %v1517_v9, 128 }
 0x2aa   :  { %1520 = vxpose.xlu0.b32.cont [9/16] %v1519_v10, 128 }
 0x2ae   :  { %1522 = vxpose.xlu0.b32.cont [10/16] %v1521_v13, 128 }
 0x2b2   :  { %1524 = vxpose.xlu0.b32.cont [11/16] %v1523_v17, 128 }
 0x2b6   :  { %1526 = vxpose.xlu0.b32.cont [12/16] %v1525_v18, 128 }
 0x2ba   :  { %1528 = vxpose.xlu0.b32.cont [13/16] %v1527_v19, 128 }
 0x2be   :  { %1530 = vxpose.xlu0.b32.cont [14/16] %v1529_v20, 128 }
 0x2c2   :  { %1532 = vxpose.xlu0.b32.cont [15/16] %v1531_v21, 128 }
 0x2c6   :  { %1534 = vxpose.xlu0.b32.end [16/16] %v1533_v22, 128 }
 0x2ea   :  { %v650_v23 = vpop.xlane.xlu0 %649 }
 0x2eb   :  { %v653_v24 = vsub.f32 %v647_v48, %v650_v23 }
 0x2ed   :  { %v655_v25 = vmul.f32 1.442695, %v653_v24 }
 0x2ef   :  { %1679 = vpow2.f32 %v655_v25 }
 0x2f9   :  { %v1680_v26 = vpop.eup %1679 }
 0x2fa   :  { %659 = vadd.xlane.f32.xlu1 %v1680_v26 }
 0x30a   :  { %v652_v27 = vpop.xlane.xlu1 %651  ;;  %v1535_v31 = vpop.trf.xlu0 }
 0x30b   :  { %v654_v28 = vsub.f32 %v648_v54, %v652_v27  ;;  %v1536_v34 = vunpack.i.l.bf16 %v1535_v31  ;;  %v1539_v35 = vunpack.i.h.bf16 %v1535_v31 }
 0x30d   :  { %v657_v29 = vmul.f32 1.442695, %v654_v28  ;;  %1389 = vmatprep.mubr.f32.mxu0 %v1536_v34  ;;  %1415 = vmatprep.mubr.f32.mxu1 %v1539_v35 }
 0x30e   :  { %v2064_v33 = vpop.trf.xlu0 }
 0x30f   :  { %1681 = vpow2.f32 %v657_v29  ;;  %v1541_v16 = vunpack.i.l.bf16 %v2064_v33  ;;  %v1544_v47 = vunpack.i.h.bf16 %v2064_v33 }
 0x312   :  { %v2066_v60 = vpop.trf.xlu0 }
 0x313   :  { %v1546_v55 = vunpack.i.l.bf16 %v2066_v60  ;;  %v1549_v48 = vunpack.i.h.bf16 %v2066_v60 }
 0x316   :  { %v2068_v61 = vpop.trf.xlu0 }
 0x317   :  { %v1551_v56 = vunpack.i.l.bf16 %v2068_v61  ;;  %v1554_v49 = vunpack.i.h.bf16 %v2068_v61 }
 0x319   :  { %v1682_v30 = vpop.eup %1681 }
 0x31a   :  { %661 = vadd.xlane.f32.xlu1 %v1682_v30  ;;  %v2070_v62 = vpop.trf.xlu0 }
 0x31b   :  { %v1556_v57 = vunpack.i.l.bf16 %v2070_v62  ;;  %v1559_v50 = vunpack.i.h.bf16 %v2070_v62 }
 0x31e   :  { %v2072_v63 = vpop.trf.xlu0 }
 0x31f   :  { %v1561_v58 = vunpack.i.l.bf16 %v2072_v63  ;;  %v1564_v51 = vunpack.i.h.bf16 %v2072_v63 }
 0x322   :  { %v2074_v0 = vpop.trf.xlu0 }
 0x323   :  { %v1566_v59 = vunpack.i.l.bf16 %v2074_v0  ;;  %v1569_v52 = vunpack.i.h.bf16 %v2074_v0 }
 0x326   :  { %v2076_v1 = vpop.trf.xlu0 }
 0x327   :  { %v1571_v32 = vunpack.i.l.bf16 %v2076_v1  ;;  %v1574_v53 = vunpack.i.h.bf16 %v2076_v1 }
 0x32a   :  { %v2078_v2 = vpop.trf.xlu0 }
 0x32b   :  { %v1576_v36 = vunpack.i.l.bf16 %v2078_v2  ;;  %v1579_v54 = vunpack.i.h.bf16 %v2078_v2 }
 0x32e   :  { %v2080_v3 = vpop.trf.xlu0 }
 0x32f   :  { %v1581_v37 = vunpack.i.l.bf16 %v2080_v3  ;;  %v1584_v9 = vunpack.i.h.bf16 %v2080_v3 }
 0x332   :  { %v2082_v4 = vpop.trf.xlu0 }
 0x333   :  { %v1586_v38 = vunpack.i.l.bf16 %v2082_v4  ;;  %v1589_v10 = vunpack.i.h.bf16 %v2082_v4 }
 0x336   :  { %v2084_v5 = vpop.trf.xlu0 }
 0x337   :  { %v1591_v40 = vunpack.i.l.bf16 %v2084_v5  ;;  %v1594_v13 = vunpack.i.h.bf16 %v2084_v5 }
 0x33a   :  { %v2086_v6 = vpop.trf.xlu0 }
 0x33b   :  { %v1596_v41 = vunpack.i.l.bf16 %v2086_v6  ;;  %v1599_v17 = vunpack.i.h.bf16 %v2086_v6 }
 0x33e   :  { %v2088_v7 = vpop.trf.xlu0 }
 0x33f   :  { %v1601_v42 = vunpack.i.l.bf16 %v2088_v7  ;;  %v1604_v18 = vunpack.i.h.bf16 %v2088_v7 }
 0x342   :  { %v2090_v8 = vpop.trf.xlu0 }
 0x343   :  { %v1606_v43 = vunpack.i.l.bf16 %v2090_v8  ;;  %v1609_v19 = vunpack.i.h.bf16 %v2090_v8 }
 0x346   :  { %v2092_v11 = vpop.trf.xlu0 }
 0x347   :  { %v1611_v44 = vunpack.i.l.bf16 %v2092_v11  ;;  %v1614_v20 = vunpack.i.h.bf16 %v2092_v11 }
 0x387   :  { %v660_v12 = vpop.xlane.xlu1 %659 }
 0x388   :  { %1683 = vrcp.f32 %v660_v12 }
 0x392   :  { %v1684_v14 = vpop.eup %1683 }
 0x393   :  { %v665_v15 = vmul.f32 %v1684_v14, %v1680_v26 }
 0x395   :  { %667 = vst [vmem:[%s2140_s5] sm:$0xff] %v665_v15  ;;  %1387 = vmatprep.subr.mxu0 %v665_v15 }
 0x396   :  { %1388 = vmatpush3.xpose.msra.mxu0 %v665_v15 }
 0x399   :  { %1390 = vmatmul.mubr.f32.vlgmr.msra.gmra.mrb[32].mxu0 %v1541_v16 }
 0x39a   :  { %1392 = vmatprep.mubr.f32.mxu0 %v1546_v55 }
 0x39d   :  { %1393 = vmatmul.mubr.f32.gmra.mrb[34].mxu0 %v1551_v56 }
 0x39e   :  { %1395 = vmatprep.mubr.f32.mxu0 %v1556_v57 }
 0x3a1   :  { %1396 = vmatmul.mubr.f32.gmra.mrb[36].mxu0 %v1561_v58 }
 0x3a2   :  { %1398 = vmatprep.mubr.f32.mxu0 %v1566_v59 }
 0x3a5   :  { %1399 = vmatmul.mubr.f32.gmra.mrb[38].mxu0 %v1571_v32 }
 0x3a6   :  { %1401 = vmatprep.mubr.f32.mxu0 %v1576_v36 }
 0x3a7   :  { %v662_v39 = vpop.xlane.xlu1 %661 }
 0x3a8   :  { %1685 = vrcp.f32 %v662_v39 }
 0x3a9   :  { %1402 = vmatmul.mubr.f32.gmra.mrb[40].mxu0 %v1581_v37 }
 0x3aa   :  { %1404 = vmatprep.mubr.f32.mxu0 %v1586_v38 }
 0x3ad   :  { %1405 = vmatmul.mubr.f32.gmra.mrb[42].mxu0 %v1591_v40 }
 0x3ae   :  { %1407 = vmatprep.mubr.f32.mxu0 %v1596_v41 }
 0x3b1   :  { %1408 = vmatmul.mubr.f32.gmra.mrb[44].mxu0 %v1601_v42 }
 0x3b2   :  { %v1686_v45 = vpop.eup %1685  ;;  %1410 = vmatprep.mubr.f32.mxu0 %v1606_v43 }
 0x3b3   :  { %v666_v46 = vmul.f32 %v1686_v45, %v1682_v30 }
 0x3b5   :  { %668 = vst [vmem:[%s2140_s5 + $0x8] sm:$0xff] %v666_v46  ;;  %1413 = vmatprep.subr.mxu1 %v666_v46  ;;  %1411 = vmatmul.mubr.f32.gmra.mrb[46].mxu0 %v1611_v44 }
 0x3b6   :  { %1414 = vmatpush3.xpose.msra.mxu1 %v666_v46 }
 0x3b9   :  { %1416 = vmatmul.mubr.f32.vlgmr.msra.gmra.mrb[32].mxu1 %v1544_v47 }
 0x3ba   :  { %1418 = vmatprep.mubr.f32.mxu1 %v1549_v48 }
 0x3bd   :  { %1419 = vmatmul.mubr.f32.gmra.mrb[34].mxu1 %v1554_v49 }
 0x3be   :  { %1421 = vmatprep.mubr.f32.mxu1 %v1559_v50 }
 0x3c1   :  { %1422 = vmatmul.mubr.f32.gmra.mrb[36].mxu1 %v1564_v51 }
 0x3c2   :  { %1424 = vmatprep.mubr.f32.mxu1 %v1569_v52 }
 0x3c5   :  { %1425 = vmatmul.mubr.f32.gmra.mrb[38].mxu1 %v1574_v53 }
 0x3c6   :  { %1427 = vmatprep.mubr.f32.mxu1 %v1579_v54 }
 0x3c9   :  { %1428 = vmatmul.mubr.f32.gmra.mrb[40].mxu1 %v1584_v9 }
 0x3ca   :  { %1430 = vmatprep.mubr.f32.mxu1 %v1589_v10 }
 0x3cd   :  { %1431 = vmatmul.mubr.f32.gmra.mrb[42].mxu1 %v1594_v13 }
 0x3ce   :  { %1433 = vmatprep.mubr.f32.mxu1 %v1599_v17 }
 0x3d1   :  { %1434 = vmatmul.mubr.f32.gmra.mrb[44].mxu1 %v1604_v18 }
 0x3d2   :  { %1436 = vmatprep.mubr.f32.mxu1 %v1609_v19 }
 0x3d5   :  { %1437 = vmatmul.mubr.f32.gmra.mrb[46].mxu1 %v1614_v20 }
 0x46c   :  { %v1391_v21 = vpop.f32.mrb[32].mxu0 }
 0x46d   :  { %v767_v22 = vpop.f32.mrb[33].mxu0 }
 0x46e   :  { %1023 = vxpose.xlu1.b32.start [1/16] (narrow) %v767_v22, 8 }
 0x470   :  { %v1394_v23 = vpop.f32.mrb[34].mxu0 }
 0x471   :  { %v777_v24 = vpop.f32.mrb[35].mxu0 }
 0x472   :  { %1024 = vxpose.xlu1.b32.cont [2/16] (narrow) %v1391_v21, 8 }
 0x474   :  { %v1397_v25 = vpop.f32.mrb[36].mxu0 }
 0x475   :  { %v787_v26 = vpop.f32.mrb[37].mxu0 }
 0x476   :  { %1025 = vxpose.xlu1.b32.cont [3/16] (narrow) %v777_v24, 8 }
 0x478   :  { %v1400_v27 = vpop.f32.mrb[38].mxu0 }
 0x479   :  { %v797_v28 = vpop.f32.mrb[39].mxu0 }
 0x47a   :  { %1026 = vxpose.xlu1.b32.cont [4/16] (narrow) %v1394_v23, 8 }
 0x47c   :  { %v1403_v29 = vpop.f32.mrb[40].mxu0 }
 0x47d   :  { %v807_v30 = vpop.f32.mrb[41].mxu0 }
 0x47e   :  { %1027 = vxpose.xlu1.b32.cont [5/16] (narrow) %v787_v26, 8 }
 0x480   :  { %v1406_v31 = vpop.f32.mrb[42].mxu0 }
 0x481   :  { %v817_v33 = vpop.f32.mrb[43].mxu0 }
 0x482   :  { %1028 = vxpose.xlu1.b32.cont [6/16] (narrow) %v1397_v25, 8 }
 0x484   :  { %v1409_v34 = vpop.f32.mrb[44].mxu0 }
 0x485   :  { %v827_v35 = vpop.f32.mrb[45].mxu0 }
 0x486   :  { %1029 = vxpose.xlu1.b32.cont [7/16] (narrow) %v797_v28, 8 }
 0x488   :  { %v1412_v60 = vpop.f32.mrb[46].mxu0 }
 0x489   :  { %v837_v61 = vpop.f32.mrb[47].mxu0 }
 0x48a   :  { %1030 = vxpose.xlu1.b32.cont [8/16] (narrow) %v1400_v27, 8 }
 0x48c   :  { %v1417_v62 = vpop.f32.mrb[32].mxu1 }
 0x48d   :  { %v944_v63 = vpop.f32.mrb[33].mxu1 }
 0x48e   :  { %1055 = vxpose.xlu0.b32.start [1/16] (narrow) %v944_v63, 8  ;;  %1031 = vxpose.xlu1.b32.cont [9/16] (narrow) %v807_v30, 8 }
 0x490   :  { %v1420_v0 = vpop.f32.mrb[34].mxu1 }
 0x491   :  { %v954_v1 = vpop.f32.mrb[35].mxu1 }
 0x492   :  { %1056 = vxpose.xlu0.b32.cont [2/16] (narrow) %v1417_v62, 8  ;;  %1032 = vxpose.xlu1.b32.cont [10/16] (narrow) %v1403_v29, 8 }
 0x494   :  { %v1423_v2 = vpop.f32.mrb[36].mxu1 }
 0x495   :  { %v964_v3 = vpop.f32.mrb[37].mxu1 }
 0x496   :  { %1057 = vxpose.xlu0.b32.cont [3/16] (narrow) %v954_v1, 8  ;;  %1033 = vxpose.xlu1.b32.cont [11/16] (narrow) %v817_v33, 8 }
 0x498   :  { %v1426_v4 = vpop.f32.mrb[38].mxu1 }
 0x499   :  { %v974_v5 = vpop.f32.mrb[39].mxu1 }
 0x49a   :  { %1058 = vxpose.xlu0.b32.cont [4/16] (narrow) %v1420_v0, 8  ;;  %1034 = vxpose.xlu1.b32.cont [12/16] (narrow) %v1406_v31, 8 }
 0x49c   :  { %v1429_v6 = vpop.f32.mrb[40].mxu1 }
 0x49d   :  { %v984_v7 = vpop.f32.mrb[41].mxu1 }
 0x49e   :  { %1059 = vxpose.xlu0.b32.cont [5/16] (narrow) %v964_v3, 8  ;;  %1035 = vxpose.xlu1.b32.cont [13/16] (narrow) %v827_v35, 8 }
 0x4a0   :  { %v1432_v8 = vpop.f32.mrb[42].mxu1 }
 0x4a1   :  { %v994_v11 = vpop.f32.mrb[43].mxu1 }
 0x4a2   :  { %1060 = vxpose.xlu0.b32.cont [6/16] (narrow) %v1423_v2, 8  ;;  %1036 = vxpose.xlu1.b32.cont [14/16] (narrow) %v1409_v34, 8 }
 0x4a4   :  { %v1435_v12 = vpop.f32.mrb[44].mxu1 }
 0x4a5   :  { %v1004_v14 = vpop.f32.mrb[45].mxu1 }
 0x4a6   :  { %1061 = vxpose.xlu0.b32.cont [7/16] (narrow) %v974_v5, 8  ;;  %1037 = vxpose.xlu1.b32.cont [15/16] (narrow) %v837_v61, 8 }
 0x4a8   :  { %v1438_v15 = vpop.f32.mrb[46].mxu1 }
 0x4a9   :  { %v1014_v16 = vpop.f32.mrb[47].mxu1 }
 0x4aa   :  { %1062 = vxpose.xlu0.b32.cont [8/16] (narrow) %v1426_v4, 8  ;;  %1038 = vxpose.xlu1.b32.end [16/16] (narrow) %v1412_v60, 8 }
 0x4ae   :  { %1063 = vxpose.xlu0.b32.cont [9/16] (narrow) %v984_v7, 8 }
 0x4b2   :  { %1064 = vxpose.xlu0.b32.cont [10/16] (narrow) %v1429_v6, 8 }
 0x4b6   :  { %1065 = vxpose.xlu0.b32.cont [11/16] (narrow) %v994_v11, 8 }
 0x4ba   :  { %1066 = vxpose.xlu0.b32.cont [12/16] (narrow) %v1432_v8, 8 }
 0x4be   :  { %1067 = vxpose.xlu0.b32.cont [13/16] (narrow) %v1004_v14, 8 }
 0x4c2   :  { %1068 = vxpose.xlu0.b32.cont [14/16] (narrow) %v1435_v12, 8 }
 0x4c6   :  { %1069 = vxpose.xlu0.b32.cont [15/16] (narrow) %v1014_v16, 8 }
 0x4ca   :  { %1070 = vxpose.xlu0.b32.end [16/16] (narrow) %v1438_v15, 8 }
 0x4ee   :  { %v1039_v55 = vpop.trf.xlu1 }
 0x4ef   :  { %1087 = vst [vmem:[%s2141_s4] sm:$0xff] %v1039_v55 }
 0x50e   :  { %v1071_v56 = vpop.trf.xlu0 }
 0x50f   :  { %1088 = vst [vmem:[%s2141_s4 + $0x8] sm:$0xff] %v1071_v56 }

</bundles_post_ra>
